<compile_context>
chip_gen: v7x
topology: tpu7x:2x2x1
jax: 0.10.0
libtpu: 0.0.40
codegen_flags: <defaults>
</compile_context>

<pallas_src>
import functools

import jax
import jax.numpy as jnp
import numpy as np
from jax import lax
from jax.experimental import pallas as pl
from jax.experimental.pallas import tpu as pltpu


# ---------------------------------------------------------------------------
# Tiling helpers
# ---------------------------------------------------------------------------

_VMEM_LIMIT_BYTES = 48 * 1024 * 1024  # > default scoped (16/32 MiB), < physical VMEM on all gens
_TB_TARGET = 128                      # MXU-filling row tile (multiple of 8)
_TK_TARGET = 512                      # contraction slab (multiple of 128)


def _pick_batch_tile(total_b):
    assert total_b % 8 == 0, "batch (including the x|x2 concat) must be a multiple of 8"
    best = 8
    for t in range(8, min(_TB_TARGET, total_b) + 1, 8):
        if total_b % t == 0:
            best = t
    # v7x has 2 TensorCores: keep >=2 steps on the parallel batch axis once the batch is
    # large enough that halving the tile does not starve the MXU.
    if best == total_b and total_b >= 128 and (total_b // 2) % 8 == 0:
        best = total_b // 2
    return best


def _pick_k_tile(d):
    if d <= _TK_TARGET:
        return d
    for t in range(_TK_TARGET, 127, -128):
        if d % t == 0:
            return t
    return d  # fallback: no K tiling (block last dim must be a multiple of 128 or the full dim)


# ---------------------------------------------------------------------------
# Kernels
# ---------------------------------------------------------------------------

def _normalize_halves_and_store(y, o1_ref, o2_ref, feat_dim):
    # Normalize(2): y / ||y||_2 per row (no eps — matches the torch Normalize module).
    y1 = y[:, :feat_dim]
    y2 = y[:, feat_dim:]
    o1_ref[...] = (y1 * lax.rsqrt(jnp.sum(y1 * y1, axis=-1, keepdims=True))).astype(o1_ref.dtype)
    o2_ref[...] = (y2 * lax.rsqrt(jnp.sum(y2 * y2, axis=-1, keepdims=True))).astype(o2_ref.dtype)


def _fused_head_dualproj_kernel(x_ref, wh_ref, bh_ref, wp_ref, bp_ref,
                                o1_ref, o2_ref, acc_ref, ssq_ref,
                                *, feat_dim, norm_proj):
    # head = Linear(dim_in, dim_in) + ReLU, fused with both projections.
    # Per grid step (i, k):
    #   f_k  = relu(x_i @ W_head[:, k-slab] + b_head[k-slab])          (TB, TK)
    #   acc += f_k @ W_proj[k-slab, :]                                  (TB, 2F)
    #   (normmlp) ssq += sum(f_k^2, -1)     accumulates row ||f||^2 over K-slabs
    # Last k: add proj bias (zeros for normmlp), apply the NormLinear row normalization of f
    # (the per-row scale commutes through the matmul: acc * rsqrt(ssq)), then Normalize(2)
    # each feat_dim-wide half into the two outputs.
    k = pl.program_id(1)

    @pl.when(k == 0)
    def _():
        acc_ref[...] = jnp.zeros_like(acc_ref)
        ssq_ref[...] = jnp.zeros_like(ssq_ref)

    f = jnp.dot(x_ref[...], wh_ref[...], preferred_element_type=jnp.float32) + bh_ref[...]
    f = jnp.maximum(f, 0.0)
    acc_ref[...] += jnp.dot(f, wp_ref[...], preferred_element_type=jnp.float32)
    if norm_proj:
        ssq_ref[...] += jnp.sum(f * f, axis=-1, keepdims=True)

    @pl.when(k == pl.num_programs(1) - 1)
    def _():
        y = acc_ref[...] + bp_ref[...]
        if norm_proj:
            # F.normalize(f, dim=1) with eps=1e-12 equivalent.
            y = y * lax.rsqrt(jnp.maximum(ssq_ref[...], 1e-24))
        _normalize_halves_and_store(y, o1_ref, o2_ref, feat_dim)


def _dualproj_kernel(x_ref, wp_ref, bp_ref, o1_ref, o2_ref, acc_ref, *, feat_dim):
    # head == 'linear': identity head; both nn.Linear projections fused, K-streamed.
    k = pl.program_id(1)

    @pl.when(k == 0)
    def _():
        acc_ref[...] = jnp.zeros_like(acc_ref)

    acc_ref[...] += jnp.dot(x_ref[...], wp_ref[...], preferred_element_type=jnp.float32)

    @pl.when(k == pl.num_programs(1) - 1)
    def _():
        _normalize_halves_and_store(acc_ref[...] + bp_ref[...], o1_ref, o2_ref, feat_dim)


# ---------------------------------------------------------------------------
# pallas_call wrappers
# ---------------------------------------------------------------------------

@functools.partial(jax.jit, static_argnames=("feat_dim", "norm_proj"))
def fused_head_dualproj(x, w_head, b_head, w_proj, b_proj, *, feat_dim, norm_proj):
    B, D = x.shape
    F2 = w_proj.shape[1]  # = 2 * feat_dim (proj1 | proj2 concatenated)
    tb = _pick_batch_tile(B)
    tk = _pick_k_tile(D)
    kernel = functools.partial(_fused_head_dualproj_kernel,
                               feat_dim=feat_dim, norm_proj=norm_proj)
    return pl.pallas_call(
        kernel,
        out_shape=(jax.ShapeDtypeStruct((B, feat_dim), x.dtype),
                   jax.ShapeDtypeStruct((B, feat_dim), x.dtype)),
        grid=(B // tb, D // tk),
        in_specs=[
            pl.BlockSpec((tb, D), lambda i, k: (i, 0)),    # x tile (block index constant over k)
            pl.BlockSpec((D, tk), lambda i, k: (0, k)),    # head-weight K-slab
            pl.BlockSpec((1, tk), lambda i, k: (0, k)),    # head-bias K-slab
            pl.BlockSpec((tk, F2), lambda i, k: (k, 0)),   # proj-weight K-slab (p1|p2 concat)
            pl.BlockSpec((1, F2), lambda i, k: (0, 0)),    # proj bias (zeros for normmlp)
        ],
        out_specs=(
            pl.BlockSpec((tb, feat_dim), lambda i, k: (i, 0)),
            pl.BlockSpec((tb, feat_dim), lambda i, k: (i, 0)),
        ),
        scratch_shapes=[
            pltpu.VMEM((tb, F2), jnp.float32),  # dual-proj accumulator
            pltpu.VMEM((tb, 1), jnp.float32),   # row ||f||^2 accumulator (normmlp)
        ],
        compiler_params=pltpu.CompilerParams(
            dimension_semantics=("parallel", "arbitrary"),
            vmem_limit_bytes=_VMEM_LIMIT_BYTES,
        ),
    )(x, w_head, b_head, w_proj, b_proj)


@functools.partial(jax.jit, static_argnames=("feat_dim",))
def dualproj(x, w_proj, b_proj, *, feat_dim):
    B, D = x.shape
    F2 = w_proj.shape[1]
    tb = _pick_batch_tile(B)
    tk = _pick_k_tile(D)
    kernel = functools.partial(_dualproj_kernel, feat_dim=feat_dim)
    return pl.pallas_call(
        kernel,
        out_shape=(jax.ShapeDtypeStruct((B, feat_dim), x.dtype),
                   jax.ShapeDtypeStruct((B, feat_dim), x.dtype)),
        grid=(B // tb, D // tk),
        in_specs=[
            pl.BlockSpec((tb, tk), lambda i, k: (i, k)),
            pl.BlockSpec((tk, F2), lambda i, k: (k, 0)),
            pl.BlockSpec((1, F2), lambda i, k: (0, 0)),
        ],
        out_specs=(
            pl.BlockSpec((tb, feat_dim), lambda i, k: (i, 0)),
            pl.BlockSpec((tb, feat_dim), lambda i, k: (i, 0)),
        ),
        scratch_shapes=[pltpu.VMEM((tb, F2), jnp.float32)],
        compiler_params=pltpu.CompilerParams(
            dimension_semantics=("parallel", "arbitrary"),
            vmem_limit_bytes=_VMEM_LIMIT_BYTES,
        ),
    )(x, w_proj, b_proj)


# ---------------------------------------------------------------------------
# RGBTriHeads (head path) in JAX + Pallas
# ---------------------------------------------------------------------------

class RGBTriHeadsPallas:
    def __init__(self, head="linear", dim_in=512, feat_dim=128, key=None):
        assert head in ("linear", "mlp", "normmlp")
        if key is None:
            key = jax.random.PRNGKey(0)
        self.head_type = head
        self.dim_in = dim_in
        self.feat_dim = feat_dim
        keys = jax.random.split(key, 6)
        scale = 1.0 / np.sqrt(dim_in)

        if head in ("mlp", "normmlp"):
            # self.head = Sequential(Linear(dim_in, dim_in), ReLU)
            self.w_head = jax.random.uniform(keys[0], (dim_in, dim_in), jnp.float32, -scale, scale)
            self.b_head = jax.random.uniform(keys[1], (1, dim_in), jnp.float32, -scale, scale)
        else:
            self.w_head = None
            self.b_head = None

        if head == "normmlp":
            # NormLinear: uniform(-1,1) init + .renorm_(2,1,1e-5).mul_(1e5). Its forward applies
            # F.normalize(weight, dim=0), which is static — hoisted here so the kernel never
            # re-normalizes the (dim_in, feat_dim) weight (review item).
            def _col_normalize(w):
                n = jnp.sqrt(jnp.sum(w * w, axis=0, keepdims=True))
                return w / jnp.maximum(n, 1e-12)

            self.w_p1 = _col_normalize(
                jax.random.uniform(keys[2], (dim_in, feat_dim), jnp.float32, -1.0, 1.0))
            self.w_p2 = _col_normalize(
                jax.random.uniform(keys[3], (dim_in, feat_dim), jnp.float32, -1.0, 1.0))
            self.b_p1 = self.b_p2 = None
            b_cat = jnp.zeros((1, 2 * feat_dim), jnp.float32)
        else:
            # nn.Linear(dim_in, feat_dim); stored pre-transposed as (dim_in, feat_dim)
            self.w_p1 = jax.random.uniform(keys[2], (dim_in, feat_dim), jnp.float32, -scale, scale)
            self.b_p1 = jax.random.uniform(keys[4], (1, feat_dim), jnp.float32, -scale, scale)
            self.w_p2 = jax.random.uniform(keys[3], (dim_in, feat_dim), jnp.float32, -scale, scale)
            self.b_p2 = jax.random.uniform(keys[5], (1, feat_dim), jnp.float32, -scale, scale)
            b_cat = jnp.concatenate([self.b_p1, self.b_p2], axis=1)

        # proj1 | proj2 fused along the output axis: one (dim_in, 2*feat_dim) weight read once.
        self.w_proj = jnp.concatenate([self.w_p1, self.w_p2], axis=1)
        self.b_proj = b_cat

    # ---- internals ---------------------------------------------------------

    def _dual_outputs(self, feats):
        """Runs head + proj1 + proj2 (fused) on encoder features of shape (B, dim_in)."""
        if self.head_type == "linear":
            return dualproj(feats, self.w_proj, self.b_proj, feat_dim=self.feat_dim)
        return fused_head_dualproj(
            feats, self.w_head, self.b_head, self.w_proj, self.b_proj,
            feat_dim=self.feat_dim, norm_proj=(self.head_type == "normmlp"))

    # x / x2 are encoder features of shape (B, dim_in); see TODO(synk) at the top.
    def forward(self, x, x2=None, mode=0):
        if mode == 0:
            B = x.shape[0]
            # Batch both views: each weight tensor is DMA'd from HBM once per forward.
            xx = jnp.concatenate([x, x2], axis=0)
            o1, o2 = self._dual_outputs(xx)
            # TODO(synk): feat_jig = self.head_jig(self.encoder(x_jig)) omitted (external module).
            return (o1[:B], o2[:B], o1[B:], o2[B:])
        elif mode == 1:
            # proj2 is also computed by the fused kernel; its cost is negligible vs. the head matmul.
            o1, _ = self._dual_outputs(x)
            return o1
        else:
            # mode 2: return encoder features unchanged (encoder itself is external).
            return x


# ---------------------------------------------------------------------------
# Pure-JAX reference (sanity check of the kernels)
# ---------------------------------------------------------------------------

def _ref_forward(model, x, x2):
    def head(f):
        if model.head_type in ("mlp", "normmlp"):
            return jnp.maximum(f @ model.w_head + model.b_head, 0.0)
        return f

    def proj(f, w, b):
        if model.head_type == "normmlp":
            fn = f / jnp.maximum(jnp.linalg.norm(f, axis=1, keepdims=True), 1e-12)
            wn = w / jnp.maximum(jnp.linalg.norm(w, axis=0, keepdims=True), 1e-12)
            y = fn @ wn
        else:
            y = f @ w + b
        return y / jnp.linalg.norm(y, axis=1, keepdims=True)

    f1, f2 = head(x), head(x2)
    return (proj(f1, model.w_p1, model.b_p1), proj(f1, model.w_p2, model.b_p2),
            proj(f2, model.w_p1, model.b_p1), proj(f2, model.w_p2, model.b_p2))


if __name__ == "__main__":
    B, DIM_IN, FEAT_DIM = 16, 512, 128  # small synthetic stand-in for dim_in = 2048 * width

    key = jax.random.PRNGKey(0)
    kx, kx2, kp = jax.random.split(key, 3)
    # Synthetic "encoder outputs" (ResNet encoder is external; see TODO(synk)).
    x = jax.random.normal(kx, (B, DIM_IN), jnp.float32)
    x2 = jax.random.normal(kx2, (B, DIM_IN), jnp.float32)

    ok = True
    for head_type in ("linear", "mlp", "normmlp"):
        model = RGBTriHeadsPallas(head=head_type, dim_in=DIM_IN, feat_dim=FEAT_DIM, key=kp)

        outs = jax.block_until_ready(model.forward(x, x2, mode=0))
        refs = _ref_forward(model, x, x2)
        for o, r in zip(outs, refs):
            if not np.allclose(np.asarray(o), np.asarray(r), rtol=2e-3, atol=2e-3):
                ok = False

        out_m1 = jax.block_until_ready(model.forward(x, mode=1))
        if out_m1.shape != (B, FEAT_DIM):
            ok = False
        if not np.allclose(np.asarray(out_m1), np.asarray(refs[0]), rtol=2e-3, atol=2e-3):
            ok = False

    if ok:
        print("KERNEL_OK")
</pallas_src>

<mosaic_0001>
module attributes {stable_mosaic.version = 11 : i64} {
  func.func @_dualproj_kernel(%arg0: i32, %arg1: i32, %arg2: memref<32x512xf32, #tpu.memory_space<vmem>>, %arg3: memref<512x256xf32, #tpu.memory_space<vmem>>, %arg4: memref<1x256xf32, #tpu.memory_space<vmem>>, %arg5: memref<32x128xf32, #tpu.memory_space<vmem>>, %arg6: memref<32x128xf32, #tpu.memory_space<vmem>>, %arg7: memref<32x256xf32, #tpu.memory_space<vmem>>) attributes {dimension_semantics = [#tpu.dimension_semantics<parallel>, #tpu.dimension_semantics<arbitrary>], iteration_bounds = array<i64: 1, 1>, scalar_prefetch = 0 : i64, scratch_operands = 1 : i64, tpu.core_type = #tpu.core_type<tc>, window_params = [{transform_indices = @transform_0, window_bounds = array<i64: 32, 512>}, {transform_indices = @transform_1, window_bounds = array<i64: 512, 256>}, {pipeline_mode = #tpu.pipeline_mode<synchronous>, transform_indices = @transform_2, window_bounds = array<i64: 1, 256>}, {transform_indices = @transform_3, window_bounds = array<i64: 32, 128>}, {transform_indices = @transform_4, window_bounds = array<i64: 32, 128>}]} {
    %c0_i32 = arith.constant 0 : i32
    %0 = arith.cmpi eq, %arg1, %c0_i32 : i32
    %1 = arith.extui %0 : i1 to i32
    %c0_i32_0 = arith.constant 0 : i32
    %2 = arith.cmpi ne, %1, %c0_i32_0 : i32
    scf.if %2 {
      %cst_10 = arith.constant 0.000000e+00 : f32
      %12 = vector.broadcast %cst_10 : f32 to vector<32x256xf32>
      %c0_11 = arith.constant 0 : index
      %c0_12 = arith.constant 0 : index
      %13 = vector.load %arg7[%c0_11, %c0_12] : memref<32x256xf32, #tpu.memory_space<vmem>>, vector<32x256xf32>
      tpu.vector_store %arg7[%c0_11, %c0_12], %12 {strides = array<i32>} : memref<32x256xf32, #tpu.memory_space<vmem>>, vector<32x256xf32>,
    } else {
    }
    %c0 = arith.constant 0 : index
    %c0_1 = arith.constant 0 : index
    %3 = vector.load %arg7[%c0, %c0_1] : memref<32x256xf32, #tpu.memory_space<vmem>>, vector<32x256xf32>
    %c0_2 = arith.constant 0 : index
    %c0_3 = arith.constant 0 : index
    %4 = vector.load %arg2[%c0_2, %c0_3] : memref<32x512xf32, #tpu.memory_space<vmem>>, vector<32x512xf32>
    %c0_4 = arith.constant 0 : index
    %c0_5 = arith.constant 0 : index
    %5 = vector.load %arg3[%c0_4, %c0_5] : memref<512x256xf32, #tpu.memory_space<vmem>>, vector<512x256xf32>
    %cst = arith.constant dense<0.000000e+00> : vector<32x256xf32>
    %6 = tpu.matmul %4, %5, %cst {dimension_numbers = #tpu.dot_dimension_numbers<[1], [0], [0], [1], [0, 0, 1, 1], [], []>} : vector<32x512xf32>, vector<512x256xf32>, vector<32x256xf32> -> vector<32x256xf32>
    %7 = arith.addf %3, %6 : vector<32x256xf32>
    %c0_6 = arith.constant 0 : index
    %c0_7 = arith.constant 0 : index
    %8 = vector.load %arg7[%c0_6, %c0_7] : memref<32x256xf32, #tpu.memory_space<vmem>>, vector<32x256xf32>
    tpu.vector_store %arg7[%c0_6, %c0_7], %7 {strides = array<i32>} : memref<32x256xf32, #tpu.memory_space<vmem>>, vector<32x256xf32>,
    %c0_i32_8 = arith.constant 0 : i32
    %9 = arith.cmpi eq, %arg1, %c0_i32_8 : i32
    %10 = arith.extui %9 : i1 to i32
    %c0_i32_9 = arith.constant 0 : i32
    %11 = arith.cmpi ne, %10, %c0_i32_9 : i32
    scf.if %11 {
      %c0_10 = arith.constant 0 : index
      %c0_11 = arith.constant 0 : index
      %12 = vector.load %arg7[%c0_10, %c0_11] : memref<32x256xf32, #tpu.memory_space<vmem>>, vector<32x256xf32>
      %c0_12 = arith.constant 0 : index
      %c0_13 = arith.constant 0 : index
      %13 = vector.load %arg4[%c0_12, %c0_13] : memref<1x256xf32, #tpu.memory_space<vmem>>, vector<1x256xf32>
      %14 = vector.broadcast %13 : vector<1x256xf32> to vector<32x256xf32>
      %15 = arith.addf %12, %14 : vector<32x256xf32>
      %16 = vector.extract_strided_slice %15 {offsets = [0, 0], sizes = [32, 128], strides = [1, 1]} : vector<32x256xf32> to vector<32x128xf32>
      %17 = vector.extract_strided_slice %15 {offsets = [0, 128], sizes = [32, 128], strides = [1, 1]} : vector<32x256xf32> to vector<32x128xf32>
      %18 = arith.mulf %16, %16 : vector<32x128xf32>
      %cst_14 = arith.constant dense<0.000000e+00> : vector<32xf32>
      %19 = vector.multi_reduction <add>, %18, %cst_14 [1] : vector<32x128xf32> to vector<32xf32>
      %20 = vector.shape_cast %19 : vector<32xf32> to vector<32x1xf32>
      %21 = math.rsqrt %20 : vector<32x1xf32>
      %22 = vector.broadcast %21 : vector<32x1xf32> to vector<32x128xf32>
      %23 = arith.mulf %16, %22 : vector<32x128xf32>
      %c0_15 = arith.constant 0 : index
      %c0_16 = arith.constant 0 : index
      %24 = vector.load %arg5[%c0_15, %c0_16] : memref<32x128xf32, #tpu.memory_space<vmem>>, vector<32x128xf32>
      tpu.vector_store %arg5[%c0_15, %c0_16], %23 {strides = array<i32>} : memref<32x128xf32, #tpu.memory_space<vmem>>, vector<32x128xf32>,
      %25 = arith.mulf %17, %17 : vector<32x128xf32>
      %cst_17 = arith.constant dense<0.000000e+00> : vector<32xf32>
      %26 = vector.multi_reduction <add>, %25, %cst_17 [1] : vector<32x128xf32> to vector<32xf32>
      %27 = vector.shape_cast %26 : vector<32xf32> to vector<32x1xf32>
      %28 = math.rsqrt %27 : vector<32x1xf32>
      %29 = vector.broadcast %28 : vector<32x1xf32> to vector<32x128xf32>
      %30 = arith.mulf %17, %29 : vector<32x128xf32>
      %c0_18 = arith.constant 0 : index
      %c0_19 = arith.constant 0 : index
      %31 = vector.load %arg6[%c0_18, %c0_19] : memref<32x128xf32, #tpu.memory_space<vmem>>, vector<32x128xf32>
      tpu.vector_store %arg6[%c0_18, %c0_19], %30 {strides = array<i32>} : memref<32x128xf32, #tpu.memory_space<vmem>>, vector<32x128xf32>,
    } else {
    }
    return
  }
  func.func @transform_0(%arg0: i32, %arg1: i32) -> (i32, i32) {
    %c0_i32 = arith.constant 0 : i32
    return %arg0, %arg1 : i32, i32
  }
  func.func @transform_1(%arg0: i32, %arg1: i32) -> (i32, i32) {
    %c0_i32 = arith.constant 0 : i32
    %c0_i32_0 = arith.constant 0 : i32
    return %arg1, %c0_i32 : i32, i32
  }
  func.func @transform_2(%arg0: i32, %arg1: i32) -> (i32, i32) {
    %c0_i32 = arith.constant 0 : i32
    %c0_i32_0 = arith.constant 0 : i32
    %c0_i32_1 = arith.constant 0 : i32
    return %c0_i32, %c0_i32_0 : i32, i32
  }
  func.func @transform_3(%arg0: i32, %arg1: i32) -> (i32, i32) {
    %c0_i32 = arith.constant 0 : i32
    %c0_i32_0 = arith.constant 0 : i32
    return %arg0, %c0_i32 : i32, i32
  }
  func.func @transform_4(%arg0: i32, %arg1: i32) -> (i32, i32) {
    %c0_i32 = arith.constant 0 : i32
    %c0_i32_0 = arith.constant 0 : i32
    return %arg0, %c0_i32 : i32, i32
  }
}

</mosaic_0001>

<bundles_post_ra>
// kernel: dualproj.1
= control target key start
LH: loop header
LB: loop body
LE: loop exit
PB: predicated region body
PF: predicated region fallthrough
CT: control target
= control target key end

     0   :  { %10 = vsyncpa [#allocation4], 0  ;;  %s866_s0 = inlined_call_operand.hbm [shape: f32[32,512], index: 0, kind: input, shape index: {}]   ;;  %s867_s1 = inlined_call_operand.hbm [shape: f32[512,256], index: 1, kind: input, shape index: {}]   ;;  %s868_s2 = inlined_call_operand.vmem [shape: f32[1,256], index: 2, kind: input, shape index: {}]   ;;  %s869_s3 = inlined_call_operand.hbm [shape: f32[32,128], index: 3, kind: output, shape index: {0}]   ;;  %s870_s4 = inlined_call_operand.hbm [shape: f32[32,128], index: 4, kind: output, shape index: {1}]  }
   0x1   :  { %11 = vsyncpa [#allocation7], 0 }
   0x2   :  { %12 = vsyncpa [#allocation5], 0 }
   0x3   :  { %13 = vsyncpa [#allocation10], 0  ;;  %s775_s15 = smov [#allocation3]   ;;  %s679_s19 = scalar_lea.hbm %s866_s0, 2048 }
   0x4   :  { %s19_s16 = sshll.u32 %s775_s15, 4  ;;  %p680_p0 = scmp.ne.s32.totalorder %s866_s0, %s679_s19  ;;  %s20_s16 = int_to_ptr.vmem [resolvable:$true] %s19_s16 }
   0x5   :  { %p683_p1 = scmp.lt.u32.totalorder %s679_s19, %s866_s0 }
   0x7   :  { %p685_p2 = pnand %p683_p1, %p680_p0 }
   0x9   :  { %688 = shalt.err (!%p685_p2)
}
   0xa   :  { %s689_s24 = scalar_lea.vmem %s20_s16, 2048  ;;  %p694_p4 = scmp.lt.s32.totalorder %s20_s16, %s20_s16 }
   0xb   :  { %p690_p3 = scmp.ne.s32.totalorder %s20_s16, %s689_s24  ;;  %p695_p5 = scmp.lt.s32.totalorder %s689_s24, %s689_s24 }
   0xd   :  { %p696_p6 = por %p695_p5, %p694_p4 }
   0xf   :  { %p697_p7 = pnand %p696_p6, %p690_p3 }
  0x11   :  { %700 = shalt.err (!%p697_p7)
}
  0x12   :  { %s776_s25 = smov 512   ;;  %s777_s26 = smov 32  }
  0x13   :  { %25 = dma.hbm_to_vmem [thread:$0]  %s866_s0, 2048, %s20_s16, [#allocation4], %s776_s25, %s776_s25, %s777_s26  }
  0x14   :  { %s778_s29 = smov [#allocation6]   ;;  %s701_s7 = scalar_lea.hbm %s867_s1, 16384 }
  0x15   :  { %s31_s30 = sshll.u32 %s778_s29, 4  ;;  %p702_p8 = scmp.ne.s32.totalorder %s867_s1, %s701_s7  ;;  %s32_s30 = int_to_ptr.vmem [resolvable:$true] %s31_s30 }
  0x16   :  { %p705_p9 = scmp.lt.u32.totalorder %s701_s7, %s867_s1 }
  0x18   :  { %p707_p10 = pnand %p705_p9, %p702_p8 }
  0x1a   :  { %710 = shalt.err (!%p707_p10)
}
  0x1b   :  { %s711_s12 = scalar_lea.vmem %s32_s30, 16384  ;;  %p716_p12 = scmp.lt.s32.totalorder %s32_s30, %s32_s30 }
  0x1c   :  { %p712_p11 = scmp.ne.s32.totalorder %s32_s30, %s711_s12  ;;  %p717_p13 = scmp.lt.s32.totalorder %s711_s12, %s711_s12 }
  0x1e   :  { %p718_p0 = por %p717_p13, %p716_p12 }
  0x20   :  { %p719_p1 = pnand %p718_p0, %p712_p11 }
  0x22   :  { %722 = shalt.err (!%p719_p1)
}
  0x23   :  { %s779_s0 = smov 256   ;;  %s780_s13 = smov 16  }
  0x24   :  { %37 = dma.hbm_to_vmem [thread:$0]  %s867_s1, 16384, %s32_s30, [#allocation7], %s779_s0, %s779_s0, %s780_s13  }
  0x25   :  { %767 = dma.done.wait [#allocation4], 2048  }
  0x26   :  { %768 = vsyncadd [#allocation4], 4294965248 }
  0x27   :  { %769 = dma.done.wait [#allocation7], 16384  }
  0x28   :  { %770 = vsyncadd [#allocation7], 4294950912  ;;  %v83_v0 = vld [vmem:[#allocation6 + $0x8] sm:$0xff]  ;;  %v85_v1 = vld [vmem:[#allocation6 + $0x18] sm:$0xff]  ;;  %s782_s18 = smov [#allocation9]  }
  0x29   :  { %v147_v2 = vld [vmem:[#allocation6 + $0x208] sm:$0xff]  ;;  %v517_v3 = vpack.c.bf16 %v85_v1, %v83_v0  ;;  %v149_v4 = vld [vmem:[#allocation6 + $0x218] sm:$0xff]  ;;  %v82_v5 = vld [vmem:[#allocation6] sm:$0xff]  ;;  %s500_s19 = sshll.u32 %s782_s18, 4  ;;  %s501_s19 = int_to_ptr.vmem [resolvable:$true] %s500_s19 }
  0x2a   :  { %v84_v6 = vld [vmem:[#allocation6 + $0x10] sm:$0xff]  ;;  %v581_v7 = vpack.c.bf16 %v149_v4, %v147_v2  ;;  %v146_v9 = vld [vmem:[#allocation6 + $0x200] sm:$0xff]  ;;  %v87_v11 = vld [vmem:[#allocation6 + $0x28] sm:$0xff] }
  0x2b   :  { %v519_v8 = vpack.c.bf16 %v84_v6, %v82_v5  ;;  %v148_v10 = vld [vmem:[#allocation6 + $0x210] sm:$0xff]  ;;  %518 = vmatprep.subr.bf16.mxu1 %v517_v3  ;;  %v89_v13 = vld [vmem:[#allocation6 + $0x38] sm:$0xff]  ;;  %v151_v14 = vld [vmem:[#allocation6 + $0x228] sm:$0xff] }
  0x2c   :  { %v583_v12 = vpack.c.bf16 %v148_v10, %v146_v9  ;;  %v153_v15 = vld [vmem:[#allocation6 + $0x238] sm:$0xff]  ;;  %582 = vmatprep.subr.bf16.mxu0 %v581_v7  ;;  %v521_v16 = vpack.c.bf16 %v89_v13, %v87_v11  ;;  %v86_v18 = vld [vmem:[#allocation6 + $0x20] sm:$0xff]  ;;  %v88_v19 = vld [vmem:[#allocation6 + $0x30] sm:$0xff] }
  0x2d   :  { %520 = vmatpush1.bf16.msra.mxu1 %v519_v8  ;;  %v585_v17 = vpack.c.bf16 %v153_v15, %v151_v14  ;;  %v150_v20 = vld [vmem:[#allocation6 + $0x220] sm:$0xff]  ;;  %v523_v21 = vpack.c.bf16 %v88_v19, %v86_v18  ;;  %v152_v22 = vld [vmem:[#allocation6 + $0x230] sm:$0xff]  ;;  %v91_v23 = vld [vmem:[#allocation6 + $0x48] sm:$0xff] }
  0x2e   :  { %584 = vmatpush1.bf16.msra.mxu0 %v583_v12  ;;  %v93_v24 = vld [vmem:[#allocation6 + $0x58] sm:$0xff]  ;;  %522 = vmatprep.subr.bf16.mxu1 %v521_v16  ;;  %v587_v25 = vpack.c.bf16 %v152_v22, %v150_v20  ;;  %v155_v27 = vld [vmem:[#allocation6 + $0x248] sm:$0xff]  ;;  %v90_v29 = vld [vmem:[#allocation6 + $0x40] sm:$0xff] }
  0x2f   :  { %586 = vmatprep.subr.bf16.mxu0 %v585_v17  ;;  %v525_v26 = vpack.c.bf16 %v93_v24, %v91_v23  ;;  %v157_v28 = vld [vmem:[#allocation6 + $0x258] sm:$0xff]  ;;  %v92_v31 = vld [vmem:[#allocation6 + $0x50] sm:$0xff]  ;;  %v154_v32 = vld [vmem:[#allocation6 + $0x240] sm:$0xff] }
  0x30   :  { %v589_v30 = vpack.c.bf16 %v157_v28, %v155_v27  ;;  %v156_v33 = vld [vmem:[#allocation6 + $0x250] sm:$0xff]  ;;  %v527_v34 = vpack.c.bf16 %v92_v31, %v90_v29  ;;  %v95_v35 = vld [vmem:[#allocation6 + $0x68] sm:$0xff]  ;;  %v97_v36 = vld [vmem:[#allocation6 + $0x78] sm:$0xff] }
  0x31   :  { %524 = vmatpush1.bf16.msra.mxu1 %v523_v21  ;;  %v159_v37 = vld [vmem:[#allocation6 + $0x268] sm:$0xff]  ;;  %v591_v38 = vpack.c.bf16 %v156_v33, %v154_v32  ;;  %v529_v39 = vpack.c.bf16 %v97_v36, %v95_v35  ;;  %v161_v40 = vld [vmem:[#allocation6 + $0x278] sm:$0xff]  ;;  %v94_v41 = vld [vmem:[#allocation6 + $0x60] sm:$0xff] }
  0x32   :  { %588 = vmatpush1.bf16.msra.mxu0 %v587_v25  ;;  %526 = vmatprep.subr.bf16.mxu1 %v525_v26  ;;  %v96_v42 = vld [vmem:[#allocation6 + $0x70] sm:$0xff]  ;;  %v593_v43 = vpack.c.bf16 %v161_v40, %v159_v37  ;;  %v158_v44 = vld [vmem:[#allocation6 + $0x260] sm:$0xff]  ;;  %v99_v46 = vld [vmem:[#allocation6 + $0x88] sm:$0xff] }
  0x33   :  { %590 = vmatprep.subr.bf16.mxu0 %v589_v30  ;;  %v160_v45 = vld [vmem:[#allocation6 + $0x270] sm:$0xff]  ;;  %v101_v47 = vld [vmem:[#allocation6 + $0x98] sm:$0xff]  ;;  %v163_v48 = vld [vmem:[#allocation6 + $0x288] sm:$0xff]  ;;  %v531_v50 = vpack.c.bf16 %v96_v42, %v94_v41 }
  0x34   :  { %v165_v49 = vld [vmem:[#allocation6 + $0x298] sm:$0xff]  ;;  %v595_v51 = vpack.c.bf16 %v160_v45, %v158_v44  ;;  %v533_v52 = vpack.c.bf16 %v101_v47, %v99_v46  ;;  %v98_v53 = vld [vmem:[#allocation6 + $0x80] sm:$0xff]  ;;  %v100_v54 = vld [vmem:[#allocation6 + $0x90] sm:$0xff] }
  0x35   :  { %528 = vmatpush1.bf16.msra.mxu1 %v527_v34  ;;  %v162_v55 = vld [vmem:[#allocation6 + $0x280] sm:$0xff]  ;;  %v597_v56 = vpack.c.bf16 %v165_v49, %v163_v48  ;;  %v164_v57 = vld [vmem:[#allocation6 + $0x290] sm:$0xff]  ;;  %v103_v58 = vld [vmem:[#allocation6 + $0xa8] sm:$0xff]  ;;  %v535_v62 = vpack.c.bf16 %v100_v54, %v98_v53 }
  0x36   :  { %592 = vmatpush1.bf16.msra.mxu0 %v591_v38  ;;  %530 = vmatprep.subr.bf16.mxu1 %v529_v39  ;;  %v105_v59 = vld [vmem:[#allocation6 + $0xb8] sm:$0xff]  ;;  %v167_v60 = vld [vmem:[#allocation6 + $0x2a8] sm:$0xff]  ;;  %v599_v63 = vpack.c.bf16 %v164_v57, %v162_v55  ;;  %v102_v1 = vld [vmem:[#allocation6 + $0xa0] sm:$0xff] }
  0x37   :  { %594 = vmatprep.subr.bf16.mxu0 %v593_v43  ;;  %v169_v61 = vld [vmem:[#allocation6 + $0x2b8] sm:$0xff]  ;;  %v537_v0 = vpack.c.bf16 %v105_v59, %v103_v58  ;;  %v104_v2 = vld [vmem:[#allocation6 + $0xb0] sm:$0xff]  ;;  %v166_v3 = vld [vmem:[#allocation6 + $0x2a0] sm:$0xff] }
  0x38   :  { %v601_v4 = vpack.c.bf16 %v169_v61, %v167_v60  ;;  %v168_v5 = vld [vmem:[#allocation6 + $0x2b0] sm:$0xff]  ;;  %v107_v6 = vld [vmem:[#allocation6 + $0xc8] sm:$0xff]  ;;  %v109_v7 = vld [vmem:[#allocation6 + $0xd8] sm:$0xff]  ;;  %v539_v10 = vpack.c.bf16 %v104_v2, %v102_v1 }
  0x39   :  { %532 = vmatpush1.bf16.msra.mxu1 %v531_v50  ;;  %v171_v8 = vld [vmem:[#allocation6 + $0x2c8] sm:$0xff]  ;;  %v173_v9 = vld [vmem:[#allocation6 + $0x2d8] sm:$0xff]  ;;  %v603_v11 = vpack.c.bf16 %v168_v5, %v166_v3  ;;  %v541_v12 = vpack.c.bf16 %v109_v7, %v107_v6  ;;  %v106_v13 = vld [vmem:[#allocation6 + $0xc0] sm:$0xff] }
  0x3a   :  { %596 = vmatpush1.bf16.msra.mxu0 %v595_v51  ;;  %534 = vmatprep.subr.bf16.mxu1 %v533_v52  ;;  %v108_v14 = vld [vmem:[#allocation6 + $0xd0] sm:$0xff]  ;;  %v170_v15 = vld [vmem:[#allocation6 + $0x2c0] sm:$0xff]  ;;  %v605_v16 = vpack.c.bf16 %v173_v9, %v171_v8  ;;  %v111_v18 = vld [vmem:[#allocation6 + $0xe8] sm:$0xff] }
  0x3b   :  { %598 = vmatprep.subr.bf16.mxu0 %v597_v56  ;;  %v172_v17 = vld [vmem:[#allocation6 + $0x2d0] sm:$0xff]  ;;  %v113_v19 = vld [vmem:[#allocation6 + $0xf8] sm:$0xff]  ;;  %v175_v20 = vld [vmem:[#allocation6 + $0x2e8] sm:$0xff]  ;;  %v543_v22 = vpack.c.bf16 %v108_v14, %v106_v13 }
  0x3c   :  { %v177_v21 = vld [vmem:[#allocation6 + $0x2f8] sm:$0xff]  ;;  %v607_v23 = vpack.c.bf16 %v172_v17, %v170_v15  ;;  %v545_v24 = vpack.c.bf16 %v113_v19, %v111_v18  ;;  %v110_v25 = vld [vmem:[#allocation6 + $0xe0] sm:$0xff]  ;;  %v112_v26 = vld [vmem:[#allocation6 + $0xf0] sm:$0xff] }
  0x3d   :  { %536 = vmatpush1.bf16.msra.mxu1 %v535_v62  ;;  %v174_v27 = vld [vmem:[#allocation6 + $0x2e0] sm:$0xff]  ;;  %v609_v28 = vpack.c.bf16 %v177_v21, %v175_v20  ;;  %v176_v29 = vld [vmem:[#allocation6 + $0x2f0] sm:$0xff]  ;;  %v115_v30 = vld [vmem:[#allocation6 + $0x108] sm:$0xff]  ;;  %v547_v34 = vpack.c.bf16 %v112_v26, %v110_v25 }
  0x3e   :  { %600 = vmatpush1.bf16.msra.mxu0 %v599_v63  ;;  %538 = vmatprep.subr.bf16.mxu1 %v537_v0  ;;  %v117_v31 = vld [vmem:[#allocation6 + $0x118] sm:$0xff]  ;;  %v179_v32 = vld [vmem:[#allocation6 + $0x308] sm:$0xff]  ;;  %v611_v35 = vpack.c.bf16 %v176_v29, %v174_v27  ;;  %v114_v37 = vld [vmem:[#allocation6 + $0x100] sm:$0xff] }
  0x3f   :  { %602 = vmatprep.subr.bf16.mxu0 %v601_v4  ;;  %v181_v33 = vld [vmem:[#allocation6 + $0x318] sm:$0xff]  ;;  %v549_v36 = vpack.c.bf16 %v117_v31, %v115_v30  ;;  %v116_v38 = vld [vmem:[#allocation6 + $0x110] sm:$0xff]  ;;  %v178_v39 = vld [vmem:[#allocation6 + $0x300] sm:$0xff] }
  0x40   :  { %v613_v40 = vpack.c.bf16 %v181_v33, %v179_v32  ;;  %v180_v41 = vld [vmem:[#allocation6 + $0x310] sm:$0xff]  ;;  %v119_v42 = vld [vmem:[#allocation6 + $0x128] sm:$0xff]  ;;  %v121_v43 = vld [vmem:[#allocation6 + $0x138] sm:$0xff]  ;;  %v551_v46 = vpack.c.bf16 %v116_v38, %v114_v37 }
  0x41   :  { %540 = vmatpush1.bf16.msra.mxu1 %v539_v10  ;;  %v183_v44 = vld [vmem:[#allocation6 + $0x328] sm:$0xff]  ;;  %v185_v45 = vld [vmem:[#allocation6 + $0x338] sm:$0xff]  ;;  %v615_v47 = vpack.c.bf16 %v180_v41, %v178_v39  ;;  %v553_v48 = vpack.c.bf16 %v121_v43, %v119_v42  ;;  %v118_v49 = vld [vmem:[#allocation6 + $0x120] sm:$0xff] }
  0x42   :  { %604 = vmatpush1.bf16.msra.mxu0 %v603_v11  ;;  %542 = vmatprep.subr.bf16.mxu1 %v541_v12  ;;  %v120_v50 = vld [vmem:[#allocation6 + $0x130] sm:$0xff]  ;;  %v182_v51 = vld [vmem:[#allocation6 + $0x320] sm:$0xff]  ;;  %v617_v52 = vpack.c.bf16 %v185_v45, %v183_v44  ;;  %v123_v54 = vld [vmem:[#allocation6 + $0x148] sm:$0xff] }
  0x43   :  { %606 = vmatprep.subr.bf16.mxu0 %v605_v16  ;;  %v184_v53 = vld [vmem:[#allocation6 + $0x330] sm:$0xff]  ;;  %v125_v55 = vld [vmem:[#allocation6 + $0x158] sm:$0xff]  ;;  %v187_v56 = vld [vmem:[#allocation6 + $0x348] sm:$0xff]  ;;  %v555_v58 = vpack.c.bf16 %v120_v50, %v118_v49 }
  0x44   :  { %v189_v57 = vld [vmem:[#allocation6 + $0x358] sm:$0xff]  ;;  %v619_v59 = vpack.c.bf16 %v184_v53, %v182_v51  ;;  %v557_v60 = vpack.c.bf16 %v125_v55, %v123_v54  ;;  %v122_v61 = vld [vmem:[#allocation6 + $0x140] sm:$0xff]  ;;  %v124_v62 = vld [vmem:[#allocation6 + $0x150] sm:$0xff] }
  0x45   :  { %544 = vmatpush1.bf16.msra.mxu1 %v543_v22  ;;  %v186_v63 = vld [vmem:[#allocation6 + $0x340] sm:$0xff]  ;;  %v621_v0 = vpack.c.bf16 %v189_v57, %v187_v56  ;;  %v188_v1 = vld [vmem:[#allocation6 + $0x350] sm:$0xff]  ;;  %v127_v2 = vld [vmem:[#allocation6 + $0x168] sm:$0xff]  ;;  %v559_v6 = vpack.c.bf16 %v124_v62, %v122_v61 }
  0x46   :  { %608 = vmatpush1.bf16.msra.mxu0 %v607_v23  ;;  %546 = vmatprep.subr.bf16.mxu1 %v545_v24  ;;  %v129_v3 = vld [vmem:[#allocation6 + $0x178] sm:$0xff]  ;;  %v191_v4 = vld [vmem:[#allocation6 + $0x368] sm:$0xff]  ;;  %v126_v7 = vld [vmem:[#allocation6 + $0x160] sm:$0xff]  ;;  %v623_v8 = vpack.c.bf16 %v188_v1, %v186_v63 }
  0x47   :  { %610 = vmatprep.subr.bf16.mxu0 %v609_v28  ;;  %v193_v5 = vld [vmem:[#allocation6 + $0x378] sm:$0xff]  ;;  %v561_v9 = vpack.c.bf16 %v129_v3, %v127_v2  ;;  %v128_v10 = vld [vmem:[#allocation6 + $0x170] sm:$0xff]  ;;  %v190_v11 = vld [vmem:[#allocation6 + $0x360] sm:$0xff] }
  0x48   :  { %v192_v12 = vld [vmem:[#allocation6 + $0x370] sm:$0xff]  ;;  %v625_v13 = vpack.c.bf16 %v193_v5, %v191_v4  ;;  %v131_v14 = vld [vmem:[#allocation6 + $0x188] sm:$0xff]  ;;  %v133_v15 = vld [vmem:[#allocation6 + $0x198] sm:$0xff]  ;;  %v563_v20 = vpack.c.bf16 %v128_v10, %v126_v7 }
  0x49   :  { %548 = vmatpush1.bf16.msra.mxu1 %v547_v34  ;;  %v67_v16 = vld [vmem:[#allocation3 + $0x8] sm:$0xff]  ;;  %v197_v18 = vld [vmem:[#allocation6 + $0x398] sm:$0xff]  ;;  %v627_v21 = vpack.c.bf16 %v192_v12, %v190_v11  ;;  %v565_v22 = vpack.c.bf16 %v133_v15, %v131_v14  ;;  %v130_v23 = vld [vmem:[#allocation6 + $0x180] sm:$0xff] }
  0x4a   :  { %612 = vmatpush1.bf16.msra.mxu0 %v611_v35  ;;  %550 = vmatprep.subr.bf16.mxu1 %v549_v36  ;;  %v195_v17 = vld [vmem:[#allocation6 + $0x388] sm:$0xff]  ;;  %v69_v19 = vld [vmem:[#allocation3 + $0x18] sm:$0xff]  ;;  %v132_v24 = vld [vmem:[#allocation6 + $0x190] sm:$0xff] }
  0x4b   :  { %614 = vmatprep.subr.bf16.mxu0 %v613_v40  ;;  %274 = vmatprep.mubr.f32.mxu1 %v67_v16  ;;  %v194_v25 = vld [vmem:[#allocation6 + $0x380] sm:$0xff]  ;;  %v629_v26 = vpack.c.bf16 %v197_v18, %v195_v17  ;;  %v196_v27 = vld [vmem:[#allocation6 + $0x390] sm:$0xff]  ;;  %v135_v28 = vld [vmem:[#allocation6 + $0x1a8] sm:$0xff]  ;;  %v567_v32 = vpack.c.bf16 %v132_v24, %v130_v23  ;;  %v417_v16 = vlaneseq }
  0x4c   :  { %363 = vmatprep.mubr.f32.mxu0 %v69_v19  ;;  %v137_v29 = vld [vmem:[#allocation6 + $0x1b8] sm:$0xff]  ;;  %v199_v30 = vld [vmem:[#allocation6 + $0x3a8] sm:$0xff]  ;;  %v631_v33 = vpack.c.bf16 %v196_v27, %v194_v25  ;;  %v134_v35 = vld [vmem:[#allocation6 + $0x1a0] sm:$0xff] }
  0x4d   :  { %552 = vmatpush1.bf16.msra.mxu1 %v551_v46  ;;  %v201_v31 = vld [vmem:[#allocation6 + $0x3b8] sm:$0xff]  ;;  %v569_v34 = vpack.c.bf16 %v137_v29, %v135_v28  ;;  %v136_v36 = vld [vmem:[#allocation6 + $0x1b0] sm:$0xff]  ;;  %v198_v37 = vld [vmem:[#allocation6 + $0x3a0] sm:$0xff]  ;;  %v418_v17 = vshrl.u32 %v417_v16, 7 }
  0x4e   :  { %616 = vmatpush1.bf16.msra.mxu0 %v615_v47  ;;  %554 = vmatprep.subr.bf16.mxu1 %v553_v48  ;;  %v633_v38 = vpack.c.bf16 %v201_v31, %v199_v30  ;;  %v200_v39 = vld [vmem:[#allocation6 + $0x3b0] sm:$0xff]  ;;  %v139_v40 = vld [vmem:[#allocation6 + $0x1c8] sm:$0xff]  ;;  %v141_v41 = vld [vmem:[#allocation6 + $0x1d8] sm:$0xff]  ;;  %v571_v44 = vpack.c.bf16 %v136_v36, %v134_v35 }
  0x4f   :  { %618 = vmatprep.subr.bf16.mxu0 %v617_v52  ;;  %v203_v42 = vld [vmem:[#allocation6 + $0x3c8] sm:$0xff]  ;;  %v205_v43 = vld [vmem:[#allocation6 + $0x3d8] sm:$0xff]  ;;  %v635_v45 = vpack.c.bf16 %v200_v39, %v198_v37  ;;  %v573_v46 = vpack.c.bf16 %v141_v41, %v139_v40  ;;  %v138_v47 = vld [vmem:[#allocation6 + $0x1c0] sm:$0xff]  ;;  %v419_v18 = vsub.s32 0, %v418_v17 }
  0x50   :  { %v140_v48 = vld [vmem:[#allocation6 + $0x1d0] sm:$0xff]  ;;  %v202_v49 = vld [vmem:[#allocation6 + $0x3c0] sm:$0xff]  ;;  %v637_v50 = vpack.c.bf16 %v205_v43, %v203_v42  ;;  %v143_v52 = vld [vmem:[#allocation6 + $0x1e8] sm:$0xff] }
  0x51   :  { %556 = vmatpush1.bf16.msra.mxu1 %v555_v58  ;;  %v204_v51 = vld [vmem:[#allocation6 + $0x3d0] sm:$0xff]  ;;  %v145_v53 = vld [vmem:[#allocation6 + $0x1f8] sm:$0xff]  ;;  %v207_v54 = vld [vmem:[#allocation6 + $0x3e8] sm:$0xff]  ;;  %v575_v56 = vpack.c.bf16 %v140_v48, %v138_v47 }
  0x52   :  { %620 = vmatpush1.bf16.msra.mxu0 %v619_v59  ;;  %558 = vmatprep.subr.bf16.mxu1 %v557_v60  ;;  %v209_v55 = vld [vmem:[#allocation6 + $0x3f8] sm:$0xff]  ;;  %v639_v57 = vpack.c.bf16 %v204_v51, %v202_v49  ;;  %v577_v58 = vpack.c.bf16 %v145_v53, %v143_v52  ;;  %v142_v59 = vld [vmem:[#allocation6 + $0x1e0] sm:$0xff]  ;;  %v144_v60 = vld [vmem:[#allocation6 + $0x1f0] sm:$0xff] }
  0x53   :  { %622 = vmatprep.subr.bf16.mxu0 %v621_v0  ;;  %v641_v61 = vpack.c.bf16 %v209_v55, %v207_v54  ;;  %v206_v62 = vld [vmem:[#allocation6 + $0x3e0] sm:$0xff]  ;;  %v208_v63 = vld [vmem:[#allocation6 + $0x3f0] sm:$0xff]  ;;  %v579_v0 = vpack.c.bf16 %v144_v60, %v142_v59  ;;  %v71_v4 = vld [vmem:[#allocation3 + $0x28] sm:$0xff] }
  0x54   :  { %v643_v1 = vpack.c.bf16 %v208_v63, %v206_v62  ;;  %v66_v2 = vld [vmem:[#allocation3] sm:$0xff]  ;;  %v68_v3 = vld [vmem:[#allocation3 + $0x10] sm:$0xff]  ;;  %v73_v5 = vld [vmem:[#allocation3 + $0x38] sm:$0xff] }
  0x55   :  { %560 = vmatpush1.bf16.msra.mxu1 %v559_v6  ;;  %v70_v6 = vld [vmem:[#allocation3 + $0x20] sm:$0xff]  ;;  %v72_v7 = vld [vmem:[#allocation3 + $0x30] sm:$0xff]  ;;  %v79_v12 = vld [vmem:[#allocation3 + $0x68] sm:$0xff] }
  0x56   :  { %624 = vmatpush1.bf16.msra.mxu0 %v623_v8  ;;  %562 = vmatprep.subr.bf16.mxu1 %v561_v9  ;;  %v75_v8 = vld [vmem:[#allocation3 + $0x48] sm:$0xff]  ;;  %v77_v9 = vld [vmem:[#allocation3 + $0x58] sm:$0xff]  ;;  %v74_v10 = vld [vmem:[#allocation3 + $0x40] sm:$0xff] }
  0x57   :  { %626 = vmatprep.subr.bf16.mxu0 %v625_v13  ;;  %v76_v11 = vld [vmem:[#allocation3 + $0x50] sm:$0xff]  ;;  %v81_v13 = vld [vmem:[#allocation3 + $0x78] sm:$0xff]  ;;  %v78_v14 = vld [vmem:[#allocation3 + $0x60] sm:$0xff] }
  0x58   :  { %v80_v15 = vld [vmem:[#allocation3 + $0x70] sm:$0xff]  ;;  %v415_v19 = vld [vmem:[%s868_s2] sm:$0x3]  ;;  %s781_s2 = smov [#allocation8]  }
  0x59   :  { %564 = vmatpush1.bf16.msra.mxu1 %v563_v20  ;;  %v423_v20 = vsub.s32 1, %v418_v17  ;;  %s488_s17 = sshll.u32 %s781_s2, 4  ;;  %s489_s17 = int_to_ptr.vmem [resolvable:$true] %s488_s17 }
  0x5a   :  { %628 = vmatpush1.bf16.msra.mxu0 %v627_v21  ;;  %566 = vmatprep.subr.bf16.mxu1 %v565_v22  ;;  %v420_v22 = vrot.slane %v415_v19, %v419_v18  ;;  %s723_s20 = scalar_lea.vmem %s489_s17, 512  ;;  %p728_p3 = scmp.lt.s32.totalorder %s489_s17, %s489_s17 }
  0x5b   :  { %630 = vmatprep.subr.bf16.mxu0 %v629_v26  ;;  %v424_v27 = vrot.slane %v415_v19, %v423_v20  ;;  %p724_p2 = scmp.ne.s32.totalorder %s489_s17, %s723_s20  ;;  %p729_p4 = scmp.lt.s32.totalorder %s723_s20, %s723_s20 }
  0x5d   :  { %568 = vmatpush1.bf16.msra.mxu1 %v567_v32  ;;  %p730_p5 = por %p729_p4, %p728_p3 }
  0x5e   :  { %632 = vmatpush1.bf16.msra.mxu0 %v631_v33  ;;  %570 = vmatprep.subr.bf16.mxu1 %v569_v34 }
  0x5f   :  { %634 = vmatprep.subr.bf16.mxu0 %v633_v38  ;;  %p731_p6 = pnand %p730_p5, %p724_p2 }
  0x61   :  { %572 = vmatpush1.bf16.msra.mxu1 %v571_v44 }
  0x62   :  { %636 = vmatpush1.bf16.msra.mxu0 %v635_v45  ;;  %574 = vmatprep.subr.bf16.mxu1 %v573_v46 }
  0x63   :  { %638 = vmatprep.subr.bf16.mxu0 %v637_v50 }
  0x65   :  { %576 = vmatpush1.bf16.msra.mxu1 %v575_v56 }
  0x66   :  { %640 = vmatpush1.bf16.msra.mxu0 %v639_v57  ;;  %578 = vmatprep.subr.bf16.mxu1 %v577_v58 }
  0x67   :  { %642 = vmatprep.subr.bf16.mxu0 %v641_v61 }
  0x69   :  { %580 = vmatpush1.bf16.msra.mxu1 %v579_v0 }
  0x6a   :  { %644 = vmatpush1.bf16.msra.mxu0 %v643_v1 }
  0x6c   :  { %275 = vmatmul.mubr.f32.vlgmr.msra.gmra.mrb[0].mxu1 %v66_v2 }
  0x6d   :  { %364 = vmatmul.mubr.f32.vlgmr.msra.gmra.mrb[0].mxu0 %v68_v3  ;;  %280 = vmatprep.mubr.f32.mxu1 %v71_v4 }
  0x6e   :  { %369 = vmatprep.mubr.f32.mxu0 %v73_v5 }
  0x70   :  { %281 = vmatmul.mubr.f32.gmra.mrb[2].mxu1 %v70_v6 }
  0x71   :  { %370 = vmatmul.mubr.f32.gmra.mrb[2].mxu0 %v72_v7  ;;  %286 = vmatprep.mubr.f32.mxu1 %v75_v8 }
  0x72   :  { %375 = vmatprep.mubr.f32.mxu0 %v77_v9 }
  0x74   :  { %287 = vmatmul.mubr.f32.gmra.mrb[4].mxu1 %v74_v10 }
  0x75   :  { %376 = vmatmul.mubr.f32.gmra.mrb[4].mxu0 %v76_v11  ;;  %292 = vmatprep.mubr.f32.mxu1 %v79_v12 }
  0x76   :  { %381 = vmatprep.mubr.f32.mxu0 %v81_v13 }
  0x78   :  { %293 = vmatmul.mubr.f32.gmra.mrb[6].mxu1 %v78_v14 }
  0x79   :  { %382 = vmatmul.mubr.f32.gmra.mrb[6].mxu0 %v80_v15 }
 0x13f   :  { %v276_v21 = vpop.f32.mrb[0].mxu1 }
 0x140   :  { %v365_v23 = vpop.f32.mrb[0].mxu0  ;;  %v278_v24 = vpop.f32.mrb[1].mxu1 }
 0x141   :  { %v366_v25 = vadd.f32 %v365_v23, %v276_v21  ;;  %v367_v26 = vpop.f32.mrb[1].mxu0 }
 0x142   :  { %v368_v28 = vadd.f32 %v367_v26, %v278_v24 }
 0x143   :  { %v282_v29 = vpop.f32.mrb[2].mxu1  ;;  %v427_v30 = vadd.f32 %v420_v22, %v366_v25 }
 0x144   :  { %v371_v31 = vpop.f32.mrb[2].mxu0  ;;  %v284_v32 = vpop.f32.mrb[3].mxu1  ;;  %v428_v33 = vadd.f32 %v424_v27, %v368_v28 }
 0x145   :  { %v372_v34 = vadd.f32 %v371_v31, %v282_v29  ;;  %v373_v35 = vpop.f32.mrb[3].mxu0  ;;  %v435_v36 = vmul.f32 %v427_v30, %v427_v30 }
 0x146   :  { %v374_v37 = vadd.f32 %v373_v35, %v284_v32  ;;  %v459_v45 = vmul.f32 %v428_v33, %v428_v33 }
 0x147   :  { %439 = vadd.xlane.f32.xlu0 %v435_v36  ;;  %v288_v38 = vpop.f32.mrb[4].mxu1  ;;  %v429_v42 = vadd.f32 %v420_v22, %v372_v34 }
 0x148   :  { %v377_v39 = vpop.f32.mrb[4].mxu0  ;;  %v290_v40 = vpop.f32.mrb[5].mxu1  ;;  %v430_v41 = vadd.f32 %v424_v27, %v374_v37 }
 0x149   :  { %v378_v43 = vadd.f32 %v377_v39, %v288_v38  ;;  %v379_v44 = vpop.f32.mrb[5].mxu0  ;;  %v436_v55 = vmul.f32 %v429_v42, %v429_v42 }
 0x14a   :  { %v380_v46 = vadd.f32 %v379_v44, %v290_v40  ;;  %v460_v47 = vmul.f32 %v430_v41, %v430_v41 }
 0x14b   :  { %v431_v48 = vadd.f32 %v420_v22, %v378_v43  ;;  %463 = vadd.xlane.f32.xlu0 %v459_v45  ;;  %v294_v49 = vpop.f32.mrb[6].mxu1 }
 0x14c   :  { %v383_v50 = vpop.f32.mrb[6].mxu0  ;;  %465 = vadd.xlane.f32.xlu1 %v460_v47  ;;  %v296_v51 = vpop.f32.mrb[7].mxu1  ;;  %v432_v52 = vadd.f32 %v424_v27, %v380_v46 }
 0x14d   :  { %v384_v53 = vadd.f32 %v383_v50, %v294_v49  ;;  %v385_v54 = vpop.f32.mrb[7].mxu0  ;;  %v437_v56 = vmul.f32 %v431_v48, %v431_v48 }
 0x14e   :  { %v386_v57 = vadd.f32 %v385_v54, %v296_v51  ;;  %v461_v59 = vmul.f32 %v432_v52, %v432_v52 }
 0x14f   :  { %v433_v58 = vadd.f32 %v420_v22, %v384_v53  ;;  %441 = vadd.xlane.f32.xlu0 %v436_v55 }
 0x150   :  { %443 = vadd.xlane.f32.xlu1 %v437_v56  ;;  %v837_v61 = vadd.f32 %v424_v27, %v386_v57 }
 0x151   :  { %v438_v60 = vmul.f32 %v433_v58, %v433_v58 }
 0x152   :  { %v462_v62 = vmul.f32 %v837_v61, %v837_v61 }
 0x153   :  { %467 = vadd.xlane.f32.xlu0 %v461_v59 }
 0x154   :  { %445 = vadd.xlane.f32.xlu1 %v438_v60 }
 0x158   :  { %469 = vadd.xlane.f32.xlu1 %v462_v62 }
 0x1d4   :  { %v440_v63 = vpop.xlane.xlu0 %439 }
 0x1d5   :  { %663 = vrsqrt.f32 %v440_v63 }
 0x1d8   :  { %v464_v0 = vpop.xlane.xlu0 %463 }
 0x1d9   :  { %665 = vrsqrt.f32 %v464_v0  ;;  %v466_v1 = vpop.xlane.xlu1 %465 }
 0x1da   :  { %667 = vrsqrt.f32 %v466_v1 }
 0x1dc   :  { %v442_v2 = vpop.xlane.xlu0 %441 }
 0x1dd   :  { %669 = vrsqrt.f32 %v442_v2  ;;  %v444_v3 = vpop.xlane.xlu1 %443 }
 0x1de   :  { %671 = vrsqrt.f32 %v444_v3 }
 0x1df   :  { %v664_v4 = vpop.eup %663 }
 0x1e0   :  { %v451_v5 = vmul.f32 %v664_v4, %v427_v30  ;;  %v468_v6 = vpop.xlane.xlu0 %467 }
 0x1e1   :  { %673 = vrsqrt.f32 %v468_v6  ;;  %v446_v7 = vpop.xlane.xlu1 %445 }
 0x1e2   :  { %455 = vst [vmem:[#allocation8] sm:$0xff] %v451_v5  ;;  %675 = vrsqrt.f32 %v446_v7 }
 0x1e3   :  { %v666_v8 = vpop.eup %665 }
 0x1e4   :  { %v668_v9 = vpop.eup %667  ;;  %v475_v10 = vmul.f32 %v666_v8, %v428_v33 }
 0x1e5   :  { %v476_v11 = vmul.f32 %v668_v9, %v430_v41  ;;  %v470_v12 = vpop.xlane.xlu1 %469 }
 0x1e6   :  { %479 = vst [vmem:[#allocation9] sm:$0xff] %v475_v10  ;;  %677 = vrsqrt.f32 %v470_v12 }
 0x1e7   :  { %v670_v13 = vpop.eup %669  ;;  %480 = vst [vmem:[#allocation9 + $0x8] sm:$0xff] %v476_v11 }
 0x1e8   :  { %v672_v14 = vpop.eup %671  ;;  %v452_v15 = vmul.f32 %v670_v13, %v429_v42 }
 0x1e9   :  { %v453_v16 = vmul.f32 %v672_v14, %v431_v48 }
 0x1ea   :  { %456 = vst [vmem:[#allocation8 + $0x8] sm:$0xff] %v452_v15 }
 0x1eb   :  { %v674_v17 = vpop.eup %673  ;;  %457 = vst [vmem:[#allocation8 + $0x10] sm:$0xff] %v453_v16 }
 0x1ec   :  { %v676_v18 = vpop.eup %675  ;;  %v477_v19 = vmul.f32 %v674_v17, %v432_v52 }
 0x1ed   :  { %v454_v20 = vmul.f32 %v676_v18, %v433_v58 }
 0x1ee   :  { %481 = vst [vmem:[#allocation9 + $0x10] sm:$0xff] %v477_v19 }
 0x1ef   :  { %458 = vst [vmem:[#allocation8 + $0x18] sm:$0xff] %v454_v20 }
 0x1f0   :  { %v678_v21 = vpop.eup %677 }
 0x1f1   :  { %734 = shalt.err (!%p731_p6)
}
 0x1f2   :  { %s735_s23 = scalar_lea.hbm %s869_s3, 512 }
 0x1f3   :  { %p736_p7 = scmp.ne.s32.totalorder %s869_s3, %s735_s23  ;;  %p739_p8 = scmp.lt.u32.totalorder %s735_s23, %s869_s3 }
 0x1f5   :  { %p741_p9 = pnand %p739_p8, %p736_p7 }
 0x1f7   :  { %744 = shalt.err (!%p741_p9)
}
 0x1f8   :  { %s783_s28 = smov 128   ;;  %s784_s29 = smov 8   ;;  %v478_v22 = vmul.f32 %v678_v21, %v837_v61 }
 0x1f9   :  { %494 = dma.vmem_to_hbm [thread:$0]  %s489_s17, 512, %s869_s3, [#allocation5], %s783_s28, %s783_s28, %s784_s29  }
 0x1fa   :  { %482 = vst [vmem:[#allocation9 + $0x18] sm:$0xff] %v478_v22  ;;  %s745_s6 = scalar_lea.vmem %s501_s19, 512  ;;  %p750_p11 = scmp.lt.s32.totalorder %s501_s19, %s501_s19 }
 0x1fb   :  { %p746_p10 = scmp.ne.s32.totalorder %s501_s19, %s745_s6  ;;  %p751_p12 = scmp.lt.s32.totalorder %s745_s6, %s745_s6 }
 0x1fd   :  { %p752_p13 = por %p751_p12, %p750_p11 }
 0x1ff   :  { %p753_p0 = pnand %p752_p13, %p746_p10 }
 0x201   :  { %756 = shalt.err (!%p753_p0)
}
 0x202   :  { %s757_s9 = scalar_lea.hbm %s870_s4, 512 }
 0x203   :  { %p758_p1 = scmp.ne.s32.totalorder %s870_s4, %s757_s9  ;;  %p761_p2 = scmp.lt.u32.totalorder %s757_s9, %s870_s4 }
 0x205   :  { %p763_p3 = pnand %p761_p2, %p758_p1 }
 0x207   :  { %766 = shalt.err (!%p763_p3)
}
 0x208   :  { %506 = dma.vmem_to_hbm [thread:$0]  %s501_s19, 512, %s870_s4, [#allocation10], %s783_s28, %s783_s28, %s784_s29  }
 0x209   :  { %771 = dma.done.wait [#allocation5], 512  }
 0x20a   :  { %772 = vsyncadd [#allocation5], 4294966784 }
 0x20b   :  { %773 = dma.done.wait [#allocation10], 512  }
 0x20c   :  { %774 = vsyncadd [#allocation10], 4294966784 }
 0x20d   :  { %513 = vsyncpa [#allocation4], 1 }
 0x20e   :  { %514 = vsyncpa [#allocation7], 1 }
 0x20f   :  { %515 = vsyncpa [#allocation5], 1 }
 0x210   :  { %516 = vsyncpa [#allocation10], 1 }

</bundles_post_ra>
